<compile_context>
chip_gen: v7x
topology: tpu7x:2x2x1
jax: 0.10.0
libtpu: 0.0.40
codegen_flags: <defaults>
</compile_context>

<pallas_src>
import functools

import jax
import jax.numpy as jnp
from jax.experimental import pallas as pl
from jax.experimental.pallas import tpu as pltpu


# ----------------------------------------------------------------------------
# Kernels
# ----------------------------------------------------------------------------
def _residual_linear_stream_kernel(x_ref, w_ref, b_ref, xr_ref, o_ref, acc_ref):
    """K-streaming path: one (TM, TN) output tile accumulated over the K grid axis."""
    k = pl.program_id(2)

    @pl.when(k == 0)
    def _():
        acc_ref[...] = jnp.zeros_like(acc_ref)

    acc_ref[...] += jnp.dot(
        x_ref[...], w_ref[...], preferred_element_type=jnp.float32
    )

    @pl.when(k == pl.num_programs(2) - 1)
    def _():
        y = acc_ref[...]
        y = y + b_ref[...].astype(jnp.float32)
        y = y + xr_ref[...].astype(jnp.float32)   # ResidualAdd: fn(x) + x
        o_ref[...] = y.astype(o_ref.dtype)


def _residual_linear_kfull_kernel(x_ref, w_ref, b_ref, xr_ref, o_ref):
    """K-collapsed (weight-resident) path: full reduction in one step, no scratch."""
    y = jnp.dot(x_ref[...], w_ref[...], preferred_element_type=jnp.float32)
    y = y + b_ref[...].astype(jnp.float32)
    y = y + xr_ref[...].astype(jnp.float32)       # ResidualAdd: fn(x) + x
    o_ref[...] = y.astype(o_ref.dtype)


# ----------------------------------------------------------------------------
# Tile planning helpers
# ----------------------------------------------------------------------------
def _round_up(a: int, m: int) -> int:
    return (a + m - 1) // m * m


def _sublane_granule(dtype) -> int:
    # rows per packed vreg sublane group: 8 (f32), 16 (bf16), 32 (int8/fp8)
    return {4: 8, 2: 16, 1: 32}.get(jnp.dtype(dtype).itemsize, 8)


def _vmem_budget_bytes() -> int:
    cap = 64 * 1024 * 1024                       # conservative (v7x-sized) fallback
    try:
        info = pltpu.get_tpu_info()
        cap = int(getattr(info, "vmem_capacity_bytes", cap)) or cap
    except Exception:
        pass
    # ~80% of physical VMEM: ~51 MiB on v7x, ~102 MiB on v5e/v6e (headroom for
    # Mosaic internal scratch / semaphores / pipeline slack).
    return int(cap * 0.8)


def _plan(M, D_pad, dtype, budget, tm, tn, tk):
    """Return (TM, M_pad, TN, TK, k_full, vmem_need_bytes)."""
    itemsize = jnp.dtype(dtype).itemsize
    gran = _sublane_granule(dtype)

    # ---- TM: sublane granule for small M; {512,256,128} minimizing pad waste. ----
    if tm is not None:
        TM = int(tm)
        if TM % gran != 0:
            raise ValueError(f"tm={TM} must be a multiple of {gran} for {dtype}")
    elif M < 128:
        TM = _round_up(M, gran)
    else:
        TM = min((512, 256, 128), key=lambda c: (_round_up(M, c) - M, -c))
    M_pad = _round_up(M, TM)

    # ---- TN / TK candidates (must divide padded hidden dim; checked for overrides). ----
    if tn is not None and D_pad % int(tn) != 0:
        raise ValueError(f"tn={tn} must divide the padded hidden dim {D_pad}")
    if tk is not None and D_pad % int(tk) != 0:
        raise ValueError(f"tk={tk} must divide the padded hidden dim {D_pad}")
    tn_cands = [int(tn)] if tn is not None else (
        [c for c in (512, 256, 128) if D_pad % c == 0] or [D_pad])
    tk_cands = [int(tk)] if tk is not None else (
        [c for c in (1024, 512, 256, 128) if D_pad % c == 0] or [D_pad])

    def kfull_need(TN):
        # double-buffered x / W / bias / residual / output; no f32 accumulator.
        return (2 * TM * D_pad + 2 * D_pad * TN + 2 * TN + 4 * TM * TN) * itemsize

    def stream_need(TN, TK):
        # 2x x/bias/residual/out buffers, 3x W (pl.Buffered(3)), f32 accumulator.
        return ((2 * TM * TK + 3 * TK * TN + 2 * TN + 4 * TM * TN) * itemsize
                + TM * TN * 4)

    # ---- K-collapsed fast path: TK = D_pad (TN = D_pad too when it fits). ----
    if tk is None:
        kfull_tn_cands = [int(tn)] if tn is not None else \
            sorted(set([D_pad] + tn_cands), reverse=True)
        for TN in kfull_tn_cands:
            if kfull_need(TN) <= budget:
                # keep >= 2 blocks along a parallel axis when possible (v7x megacore)
                if (tn is None and M_pad // TM == 1 and D_pad // TN == 1
                        and TN >= 256 and D_pad % (TN // 2) == 0):
                    TN //= 2
                return TM, M_pad, TN, D_pad, True, kfull_need(TN)

    # ---- streaming path: largest (TN * TK) combination that fits the budget. ----
    best = None
    for TN in tn_cands:
        for TK in tk_cands:
            need = stream_need(TN, TK)
            if need <= budget:
                key = (TN * TK, TK, TN)
                if best is None or key > best[0]:
                    best = (key, TN, TK, need)
    if best is None:
        TN, TK = tn_cands[-1], tk_cands[-1]
        need = stream_need(TN, TK)
    else:
        _, TN, TK, need = best
    return TM, M_pad, TN, TK, False, need


# ----------------------------------------------------------------------------
# Fused forward:  out = (x @ W + b) + x
# ----------------------------------------------------------------------------
@functools.partial(jax.jit, static_argnames=("tm", "tn", "tk"))
def _fused_forward(x, w_pad, b_pad, *, tm=None, tn=None, tk=None):
    B, S, D = x.shape
    D_pad = w_pad.shape[0]
    M = B * S
    dtype = x.dtype
    itemsize = jnp.dtype(dtype).itemsize

    budget = _vmem_budget_bytes()
    TM, M_pad, TN, TK, k_full, vmem_need = _plan(M, D_pad, dtype, budget, tm, tn, tk)

    # Activation padding (zero padding is exact for this op).
    x2 = x.reshape(M, D)
    if (M_pad, D_pad) != (M, D):
        x2 = jnp.pad(x2, ((0, M_pad - M), (0, D_pad - D)))

    n_i, n_j = M_pad // TM, D_pad // TN
    # Realistic HBM traffic incl. refetch factors (advisory for the XLA scheduler).
    x_a_reads = 1 if k_full else n_j
    w_reads = 1 if (k_full and TN == D_pad) else n_i
    cost = pl.CostEstimate(
        flops=2 * M_pad * D_pad * D_pad,
        transcendentals=0,
        bytes_accessed=int(
            (M_pad * D_pad * (x_a_reads + 1)      # x as A operand + residual
             + D_pad * D_pad * w_reads            # W
             + D_pad * n_i * n_j                  # bias tiles
             + M_pad * D_pad) * itemsize          # output
        ),
    )
    vmem_limit = int(min(max(vmem_need + (4 << 20), 32 << 20), budget))

    if k_full:
        grid = (n_i, n_j)
        out = pl.pallas_call(
            _residual_linear_kfull_kernel,
            out_shape=jax.ShapeDtypeStruct((M_pad, D_pad), dtype),
            grid_spec=pltpu.PrefetchScalarGridSpec(
                num_scalar_prefetch=0,
                grid=grid,
                in_specs=[
                    pl.BlockSpec((TM, D_pad), lambda i, j: (i, 0)),   # x (A operand)
                    pl.BlockSpec((D_pad, TN), lambda i, j: (0, j)),   # W (K collapsed)
                    pl.BlockSpec((1, TN), lambda i, j: (0, j)),       # bias
                    pl.BlockSpec((TM, TN), lambda i, j: (i, j)),      # x (residual)
                ],
                out_specs=pl.BlockSpec((TM, TN), lambda i, j: (i, j)),
            ),
            compiler_params=pltpu.CompilerParams(
                dimension_semantics=("parallel", "parallel"),
                vmem_limit_bytes=vmem_limit,
            ),
            cost_estimate=cost,
        )(x2, w_pad, b_pad, x2)
    else:
        grid = (n_i, n_j, D_pad // TK)
        out = pl.pallas_call(
            _residual_linear_stream_kernel,
            out_shape=jax.ShapeDtypeStruct((M_pad, D_pad), dtype),
            grid_spec=pltpu.PrefetchScalarGridSpec(
                num_scalar_prefetch=0,
                grid=grid,
                in_specs=[
                    pl.BlockSpec((TM, TK), lambda i, j, k: (i, k)),   # x (A operand)
                    pl.BlockSpec((TK, TN), lambda i, j, k: (k, j),
                                 pipeline_mode=pl.Buffered(3)),       # W (changes every k)
                    pl.BlockSpec((1, TN), lambda i, j, k: (0, j)),    # bias
                    pl.BlockSpec((TM, TN), lambda i, j, k: (i, j)),   # x (residual)
                ],
                out_specs=pl.BlockSpec((TM, TN), lambda i, j, k: (i, j)),
                scratch_shapes=[pltpu.VMEM((TM, TN), jnp.float32)],
            ),
            compiler_params=pltpu.CompilerParams(
                dimension_semantics=("parallel", "parallel", "arbitrary"),
                vmem_limit_bytes=vmem_limit,
            ),
            cost_estimate=cost,
        )(x2, w_pad, b_pad, x2)

    return out[:M, :D].reshape(B, S, D)


class ResidualAddLinear:
    """ResidualAdd(nn.Linear(hidden, hidden)):  out = (x @ W + b) + x  (fused)."""

    def __init__(self, w, b):
        D = w.shape[0]
        assert w.shape == (D, D) and b.shape == (D,)
        d_pad = _round_up(D, 128)
        p = d_pad - D
        # Parameters padded ONCE at init (hoisted out of the per-call path).
        self.w_pad = jnp.pad(w, ((0, p), (0, p))) if p else w
        self.b_pad = (jnp.pad(b, (0, p)) if p else b).reshape(1, d_pad)

    def __call__(self, x, *, tm=None, tn=None, tk=None):
        # TODO(synk): inputs are matmul'd in their native dtype; pass bf16 x/W (or add
        # an explicit bf16-cast opt-in) to hit full MXU throughput on f32 models.
        return _fused_forward(x, self.w_pad, self.b_pad, tm=tm, tn=tn, tk=tk)


def residual_add_linear_ref(x, w, b):
    # pure-JAX reference for the same ResidualAdd(Linear) forward
    return (jnp.einsum("bsd,de->bse", x, w) + b) + x


if __name__ == "__main__":
    key = jax.random.PRNGKey(0)
    k_x, k_w, k_b = jax.random.split(key, 3)

    batch, seq, hidden = 2, 8, 32
    x = jax.random.normal(k_x, (batch, seq, hidden), dtype=jnp.float32)
    # deterministic synthetic parameters (no checkpoint load)
    w = jax.random.normal(k_w, (hidden, hidden), dtype=jnp.float32) * 0.02
    b = jax.random.normal(k_b, (hidden,), dtype=jnp.float32) * 0.02

    module = ResidualAddLinear(w, b)
    out = jax.block_until_ready(module(x))

    ref = residual_add_linear_ref(x, w, b)
    assert out.shape == ref.shape
    assert jnp.allclose(out, ref, atol=1e-5, rtol=1e-5), "mismatch vs reference"

    print("KERNEL_OK")
</pallas_src>

<mosaic_0001>
module attributes {stable_mosaic.version = 11 : i64} {
  func.func @_residual_linear_kfull_kernel(%arg0: i32, %arg1: i32, %arg2: memref<16x128xf32, #tpu.memory_space<vmem>>, %arg3: memref<128x128xf32, #tpu.memory_space<vmem>>, %arg4: memref<1x128xf32, #tpu.memory_space<vmem>>, %arg5: memref<16x128xf32, #tpu.memory_space<vmem>>, %arg6: memref<16x128xf32, #tpu.memory_space<vmem>>) attributes {dimension_semantics = [#tpu.dimension_semantics<parallel>, #tpu.dimension_semantics<parallel>], iteration_bounds = array<i64: 1, 1>, scalar_prefetch = 0 : i64, scratch_operands = 0 : i64, tpu.core_type = #tpu.core_type<tc>, window_params = [{transform_indices = @transform_0, window_bounds = array<i64: 16, 128>}, {transform_indices = @transform_1, window_bounds = array<i64: 128, 128>}, {transform_indices = @transform_2, window_bounds = array<i64: 1, 128>}, {transform_indices = @transform_3, window_bounds = array<i64: 16, 128>}, {transform_indices = @transform_4, window_bounds = array<i64: 16, 128>}]} {
    %c0 = arith.constant 0 : index
    %c0_0 = arith.constant 0 : index
    %0 = vector.load %arg2[%c0, %c0_0] : memref<16x128xf32, #tpu.memory_space<vmem>>, vector<16x128xf32>
    %c0_1 = arith.constant 0 : index
    %c0_2 = arith.constant 0 : index
    %1 = vector.load %arg3[%c0_1, %c0_2] : memref<128x128xf32, #tpu.memory_space<vmem>>, vector<128x128xf32>
    %cst = arith.constant dense<0.000000e+00> : vector<16x128xf32>
    %2 = tpu.matmul %0, %1, %cst {dimension_numbers = #tpu.dot_dimension_numbers<[1], [0], [0], [1], [0, 0, 1, 1], [], []>} : vector<16x128xf32>, vector<128x128xf32>, vector<16x128xf32> -> vector<16x128xf32>
    %c0_3 = arith.constant 0 : index
    %c0_4 = arith.constant 0 : index
    %3 = vector.load %arg4[%c0_3, %c0_4] : memref<1x128xf32, #tpu.memory_space<vmem>>, vector<1x128xf32>
    %4 = vector.broadcast %3 : vector<1x128xf32> to vector<16x128xf32>
    %5 = arith.addf %2, %4 : vector<16x128xf32>
    %c0_5 = arith.constant 0 : index
    %c0_6 = arith.constant 0 : index
    %6 = vector.load %arg5[%c0_5, %c0_6] : memref<16x128xf32, #tpu.memory_space<vmem>>, vector<16x128xf32>
    %7 = arith.addf %5, %6 : vector<16x128xf32>
    %c0_7 = arith.constant 0 : index
    %c0_8 = arith.constant 0 : index
    %8 = vector.load %arg6[%c0_7, %c0_8] : memref<16x128xf32, #tpu.memory_space<vmem>>, vector<16x128xf32>
    tpu.vector_store %arg6[%c0_7, %c0_8], %7 {strides = array<i32>} : memref<16x128xf32, #tpu.memory_space<vmem>>, vector<16x128xf32>,
    return
  }
  func.func @transform_0(%arg0: i32, %arg1: i32) -> (i32, i32) {
    %c0_i32 = arith.constant 0 : i32
    %c0_i32_0 = arith.constant 0 : i32
    return %arg0, %c0_i32 : i32, i32
  }
  func.func @transform_1(%arg0: i32, %arg1: i32) -> (i32, i32) {
    %c0_i32 = arith.constant 0 : i32
    %c0_i32_0 = arith.constant 0 : i32
    return %c0_i32, %arg1 : i32, i32
  }
  func.func @transform_2(%arg0: i32, %arg1: i32) -> (i32, i32) {
    %c0_i32 = arith.constant 0 : i32
    %c0_i32_0 = arith.constant 0 : i32
    return %c0_i32, %arg1 : i32, i32
  }
  func.func @transform_3(%arg0: i32, %arg1: i32) -> (i32, i32) {
    %c0_i32 = arith.constant 0 : i32
    return %arg0, %arg1 : i32, i32
  }
  func.func @transform_4(%arg0: i32, %arg1: i32) -> (i32, i32) {
    %c0_i32 = arith.constant 0 : i32
    return %arg0, %arg1 : i32, i32
  }
}

</mosaic_0001>

<bundles_post_ra>
// kernel: _fused_forward.1
= control target key start
LH: loop header
LB: loop body
LE: loop exit
PB: predicated region body
PF: predicated region fallthrough
CT: control target
= control target key end

     0   :  { %9 = vsyncpa [#allocation3], 0  ;;  %s255_s15 = smov [#allocation2]   ;;  %s316_s0 = inlined_call_operand.vmem [shape: f32[16,128], index: 0, kind: input, shape index: {}, may-alias: {0,3}]   ;;  %s317_s1 = inlined_call_operand.hbm [shape: f32[128,128], index: 1, kind: input, shape index: {}]   ;;  %s318_s2 = inlined_call_operand.vmem [shape: f32[1,128], index: 2, kind: input, shape index: {}]   ;;  %s319_s3 = inlined_call_operand.vmem [shape: f32[16,128], index: 3, kind: input, shape index: {}, may-alias: {0,3}]   ;;  %s320_s4 = inlined_call_operand.vmem [shape: f32[16,128], index: 4, kind: output, shape index: {}]  }
   0x1   :  { %s17_s16 = sshll.u32 %s255_s15, 4  ;;  %s231_s19 = scalar_lea.hbm %s317_s1, 2048  ;;  %s18_s16 = int_to_ptr.vmem [resolvable:$true] %s17_s16 }
   0x2   :  { %p232_p0 = scmp.ne.s32.totalorder %s317_s1, %s231_s19  ;;  %p235_p1 = scmp.lt.u32.totalorder %s231_s19, %s317_s1 }
   0x4   :  { %p237_p2 = pnand %p235_p1, %p232_p0 }
   0x6   :  { %240 = shalt.err (!%p237_p2)
}
   0x7   :  { %s241_s24 = scalar_lea.vmem %s18_s16, 2048  ;;  %p246_p4 = scmp.lt.s32.totalorder %s18_s16, %s18_s16 }
   0x8   :  { %p242_p3 = scmp.ne.s32.totalorder %s18_s16, %s241_s24  ;;  %p247_p5 = scmp.lt.s32.totalorder %s241_s24, %s241_s24 }
   0xa   :  { %p248_p6 = por %p247_p5, %p246_p4 }
   0xc   :  { %p249_p7 = pnand %p248_p6, %p242_p3 }
   0xe   :  { %252 = shalt.err (!%p249_p7)
}
   0xf   :  { %s256_s25 = smov 128   ;;  %s257_s26 = smov 8  }
  0x10   :  { %23 = dma.hbm_to_vmem [thread:$0]  %s317_s1, 2048, %s18_s16, [#allocation3], %s256_s25, %s256_s25, %s257_s26  }
  0x11   :  { %253 = dma.done.wait [#allocation3], 2048  }
  0x12   :  { %254 = vsyncadd [#allocation3], 4294965248  ;;  %v33_v0 = vld [vmem:[#allocation2] sm:$0xff]  ;;  %v34_v1 = vld [vmem:[#allocation2 + $0x8] sm:$0xff] }
  0x13   :  { %v35_v2 = vld [vmem:[#allocation2 + $0x10] sm:$0xff]  ;;  %v196_v3 = vpack.c.bf16 %v34_v1, %v33_v0  ;;  %v36_v4 = vld [vmem:[#allocation2 + $0x18] sm:$0xff]  ;;  %v37_v6 = vld [vmem:[#allocation2 + $0x20] sm:$0xff] }
  0x14   :  { %v200_v5 = vpack.c.bf16 %v36_v4, %v35_v2  ;;  %v38_v7 = vld [vmem:[#allocation2 + $0x28] sm:$0xff]  ;;  %v31_v9 = vld [vmem:[%s316_s0] sm:$0xff]  ;;  %v39_v10 = vld [vmem:[#allocation2 + $0x30] sm:$0xff] }
  0x15   :  { %197 = vmatprep.subr.bf16.mxu0 %v196_v3  ;;  %v204_v8 = vpack.c.bf16 %v38_v7, %v37_v6  ;;  %v40_v11 = vld [vmem:[#allocation2 + $0x38] sm:$0xff]  ;;  %193 = vmatprep.mubr.f32.mxu0 %v31_v9  ;;  %v41_v13 = vld [vmem:[#allocation2 + $0x40] sm:$0xff]  ;;  %v42_v14 = vld [vmem:[#allocation2 + $0x48] sm:$0xff] }
  0x16   :  { %199 = vmatpush3.bf16.msra.mxu0 %v196_v3  ;;  %v208_v12 = vpack.c.bf16 %v40_v11, %v39_v10  ;;  %v212_v15 = vpack.c.bf16 %v42_v14, %v41_v13  ;;  %v43_v16 = vld [vmem:[#allocation2 + $0x50] sm:$0xff]  ;;  %v44_v17 = vld [vmem:[#allocation2 + $0x58] sm:$0xff]  ;;  %v45_v19 = vld [vmem:[#allocation2 + $0x60] sm:$0xff] }
  0x17   :  { %201 = vmatprep.subr.bf16.mxu0 %v200_v5  ;;  %v216_v18 = vpack.c.bf16 %v44_v17, %v43_v16  ;;  %v46_v20 = vld [vmem:[#allocation2 + $0x68] sm:$0xff]  ;;  %v47_v22 = vld [vmem:[#allocation2 + $0x70] sm:$0xff]  ;;  %v48_v23 = vld [vmem:[#allocation2 + $0x78] sm:$0xff] }
  0x18   :  { %v220_v21 = vpack.c.bf16 %v46_v20, %v45_v19  ;;  %v224_v24 = vpack.c.bf16 %v48_v23, %v47_v22  ;;  %v32_v25 = vld [vmem:[%s316_s0 + $0x8] sm:$0xff]  ;;  %v142_v26 = vld [vmem:[%s318_s2] ss:$0 sm:$0xff] }
  0x19   :  { %v132_v28 = vld [vmem:[%s319_s3 + $0x8] sm:$0xff]  ;;  %v131_v31 = vld [vmem:[%s319_s3] sm:$0xff] }
  0x1a   :  { %203 = vmatpush3.bf16.msra.mxu0 %v200_v5 }
  0x1b   :  { %205 = vmatprep.subr.bf16.mxu0 %v204_v8 }
  0x1e   :  { %207 = vmatpush3.bf16.msra.mxu0 %v204_v8 }
  0x1f   :  { %209 = vmatprep.subr.bf16.mxu0 %v208_v12 }
  0x22   :  { %211 = vmatpush3.bf16.msra.mxu0 %v208_v12 }
  0x23   :  { %213 = vmatprep.subr.bf16.mxu0 %v212_v15 }
  0x26   :  { %215 = vmatpush3.bf16.msra.mxu0 %v212_v15 }
  0x27   :  { %217 = vmatprep.subr.bf16.mxu0 %v216_v18 }
  0x2a   :  { %219 = vmatpush3.bf16.msra.mxu0 %v216_v18 }
  0x2b   :  { %221 = vmatprep.subr.bf16.mxu0 %v220_v21 }
  0x2e   :  { %223 = vmatpush3.bf16.msra.mxu0 %v220_v21 }
  0x2f   :  { %225 = vmatprep.subr.bf16.mxu0 %v224_v24 }
  0x32   :  { %227 = vmatpush3.bf16.msra.mxu0 %v224_v24 }
  0x35   :  { %194 = vmatmul.mubr.f32.vlgmr.msra.gmra.mrb[0].mxu0 %v32_v25 }
 0x108   :  { %v195_v27 = vpop.f32.mrb[0].mxu0 }
 0x109   :  { %v128_v29 = vadd.f32 %v195_v27, %v142_v26  ;;  %v122_v30 = vpop.f32.mrb[1].mxu0 }
 0x10a   :  { %v123_v32 = vadd.f32 %v142_v26, %v122_v30 }
 0x10b   :  { %v134_v33 = vadd.f32 %v132_v28, %v128_v29 }
 0x10c   :  { %v133_v34 = vadd.f32 %v131_v31, %v123_v32 }
 0x10d   :  { %136 = vst [vmem:[%s320_s4 + $0x8] sm:$0xff] %v134_v33 }
 0x10e   :  { %135 = vst [vmem:[%s320_s4] sm:$0xff] %v133_v34 }
 0x10f   :  { %141 = vsyncpa [#allocation3], 1 }

</bundles_post_ra>
